<compile_context>
chip_gen: v7x
topology: tpu7x:2x2x1
jax: 0.10.0
libtpu: 0.0.40
codegen_flags: <defaults>
</compile_context>

<pallas_src>
import functools

import jax
import jax.numpy as jnp
from jax.experimental import pallas as pl
from jax.experimental.pallas import tpu as pltpu


def _accuracy_kernel(y_hat_ref, y_ref, partial_ref, *, n_rows: int):
    """Counts rows (within this tile) where round(y_hat) == y for every column."""
    i = pl.program_id(0)
    tile_n = y_hat_ref.shape[0]

    # Widen to f32 in-register (inputs may be bf16/int); rounding is done in
    # f32 so results match the f32 reference even for narrow input dtypes.
    yh = y_hat_ref[...].astype(jnp.float32)
    yt = y_ref[...].astype(jnp.float32)

    # Integer mismatch mask; "all equal over dim=1" == max(mismatch) == 0.
    mismatch = (jnp.round(yh) != yt).astype(jnp.int32)            # (tile_n, C)
    row_bad = jnp.max(mismatch, axis=1, keepdims=True)            # (tile_n, 1)

    # Mask out padded rows of the last (partial) tile.
    row_ids = i * tile_n + jax.lax.broadcasted_iota(jnp.int32, (tile_n, 1), 0)
    row_ok = jnp.logical_and(row_ids < n_rows, row_bad == 0)      # (tile_n, 1)

    count = jnp.sum(row_ok.astype(jnp.float32), axis=0, keepdims=True)  # (1, 1)
    # Lane-dense, unmasked (1, 128) store of this tile's partial count.
    partial_ref[...] = jnp.broadcast_to(count, (1, 128))


def _pick_tile_n(n: int, row_bytes: int) -> int:
    """Rows per tile: ~4 MiB of input per pipeline buffer (x2 buffers = ~8 MiB VMEM)."""
    budget = 4 * 1024 * 1024
    if n <= 8 or n * row_bytes <= budget:
        return n  # whole batch fits comfortably -> single full-extent block
    t = min(budget // max(1, row_bytes), 2048, n)
    return max(8, (t // 8) * 8)


def accuracy(y_hat: jax.Array, y: jax.Array) -> jax.Array:
    """Fraction of rows where round(y_hat) == y for every column (torch semantics)."""
    assert y_hat.shape == y.shape and y_hat.ndim == 2
    n, c = y_hat.shape

    row_bytes = c * (y_hat.dtype.itemsize + y.dtype.itemsize)
    tile_n = _pick_tile_n(n, row_bytes)
    num_tiles = pl.cdiv(n, tile_n)

    kernel = functools.partial(_accuracy_kernel, n_rows=n)

    partials = pl.pallas_call(
        kernel,
        out_shape=jax.ShapeDtypeStruct((num_tiles, 128), jnp.float32),
        grid=(num_tiles,),
        in_specs=[
            pl.BlockSpec((tile_n, c), lambda i: (i, 0)),
            pl.BlockSpec((tile_n, c), lambda i: (i, 0)),
        ],
        out_specs=pl.BlockSpec((1, 128), lambda i: (i, 0)),
        compiler_params=pltpu.CompilerParams(
            dimension_semantics=("parallel",),
        ),
    )(y_hat, y)  # native dtypes: no wrapper-side up-cast (keeps HBM bytes minimal)

    correct = jnp.sum(partials[:, 0])
    return correct / jnp.float32(n)


if __name__ == "__main__":
    key = jax.random.PRNGKey(0)
    k1, k2, _ = jax.random.split(key, 3)

    N, C = 8, 32  # small batch of multi-label predictions

    # Ground-truth labels in {0, 1}.
    y = jax.random.bernoulli(k1, p=0.5, shape=(N, C)).astype(jnp.float32)

    # Predictions: labels + small noise so round(y_hat) == y for most entries,
    # then deliberately corrupt a few rows so accuracy is not trivially 1.0.
    noise = 0.2 * jax.random.normal(k2, (N, C), dtype=jnp.float32)
    y_hat = y + noise
    flip_rows = jnp.array([1, 5])
    y_hat = y_hat.at[flip_rows, 0].add(1.0)  # force a wrong rounded value

    acc = accuracy(y_hat, y)
    jax.block_until_ready(acc)

    # Reference check in plain JAX (same semantics as the torch module).
    ref = jnp.mean(jnp.all(jnp.round(y_hat) == y, axis=1).astype(jnp.float32))
    assert jnp.allclose(acc, ref), (acc, ref)

    print("KERNEL_OK")
</pallas_src>

<mosaic_0001>
module attributes {stable_mosaic.version = 11 : i64} {
  func.func @_accuracy_kernel(%arg0: i32, %arg1: memref<8x32xf32, #tpu.memory_space<vmem>>, %arg2: memref<8x32xf32, #tpu.memory_space<vmem>>, %arg3: memref<1x128xf32, #tpu.memory_space<vmem>>) attributes {dimension_semantics = [#tpu.dimension_semantics<parallel>], iteration_bounds = array<i64: 1>, scalar_prefetch = 0 : i64, scratch_operands = 0 : i64, tpu.core_type = #tpu.core_type<tc>, window_params = [{transform_indices = @transform_0, window_bounds = array<i64: 8, 32>}, {transform_indices = @transform_1, window_bounds = array<i64: 8, 32>}, {transform_indices = @transform_2, window_bounds = array<i64: 1, 128>}]} {
    %c0 = arith.constant 0 : index
    %c0_0 = arith.constant 0 : index
    %0 = vector.load %arg1[%c0, %c0_0] : memref<8x32xf32, #tpu.memory_space<vmem>>, vector<8x32xf32>
    %c0_1 = arith.constant 0 : index
    %c0_2 = arith.constant 0 : index
    %1 = vector.load %arg2[%c0_1, %c0_2] : memref<8x32xf32, #tpu.memory_space<vmem>>, vector<8x32xf32>
    %2 = math.roundeven %0 : vector<8x32xf32>
    %3 = arith.cmpf one, %2, %1 : vector<8x32xf32>
    %4 = arith.extui %3 : vector<8x32xi1> to vector<8x32xi32>
    %cst = arith.constant dense<-2147483648> : vector<8xi32>
    %5 = vector.multi_reduction <maxsi>, %4, %cst [1] : vector<8x32xi32> to vector<8xi32>
    %6 = vector.shape_cast %5 : vector<8xi32> to vector<8x1xi32>
    %c8_i32 = arith.constant 8 : i32
    %7 = arith.muli %arg0, %c8_i32 : i32
    %8 = tpu.iota {dimensions = array<i32: 0>} : vector<8x1xi32>
    %9 = vector.broadcast %7 : i32 to vector<8x1xi32>
    %10 = arith.addi %9, %8 : vector<8x1xi32>
    %c8_i32_3 = arith.constant 8 : i32
    %11 = vector.broadcast %c8_i32_3 : i32 to vector<8x1xi32>
    %12 = arith.cmpi slt, %10, %11 : vector<8x1xi32>
    %c0_i32 = arith.constant 0 : i32
    %13 = vector.broadcast %c0_i32 : i32 to vector<8x1xi32>
    %14 = arith.cmpi eq, %6, %13 : vector<8x1xi32>
    %15 = arith.andi %12, %14 : vector<8x1xi1>
    %16 = arith.extui %15 : vector<8x1xi1> to vector<8x1xi32>
    %17 = arith.sitofp %16 : vector<8x1xi32> to vector<8x1xf32>
    %cst_4 = arith.constant dense<0.000000e+00> : vector<1xf32>
    %18 = vector.multi_reduction <add>, %17, %cst_4 [0] : vector<8x1xf32> to vector<1xf32>
    %19 = vector.shape_cast %18 : vector<1xf32> to vector<1x1xf32>
    %20 = vector.shape_cast %19 : vector<1x1xf32> to vector<1x1xf32>
    %21 = vector.broadcast %20 : vector<1x1xf32> to vector<1x128xf32>
    %c0_5 = arith.constant 0 : index
    %c0_6 = arith.constant 0 : index
    %22 = vector.load %arg3[%c0_5, %c0_6] : memref<1x128xf32, #tpu.memory_space<vmem>>, vector<1x128xf32>
    tpu.vector_store %arg3[%c0_5, %c0_6], %21 {strides = array<i32>} : memref<1x128xf32, #tpu.memory_space<vmem>>, vector<1x128xf32>,
    return
  }
  func.func @transform_0(%arg0: i32) -> (i32, i32) {
    %c0_i32 = arith.constant 0 : i32
    %c0_i32_0 = arith.constant 0 : i32
    return %arg0, %c0_i32 : i32, i32
  }
  func.func @transform_1(%arg0: i32) -> (i32, i32) {
    %c0_i32 = arith.constant 0 : i32
    %c0_i32_0 = arith.constant 0 : i32
    return %arg0, %c0_i32 : i32, i32
  }
  func.func @transform_2(%arg0: i32) -> (i32, i32) {
    %c0_i32 = arith.constant 0 : i32
    %c0_i32_0 = arith.constant 0 : i32
    return %arg0, %c0_i32 : i32, i32
  }
}

</mosaic_0001>

<bundles_post_ra>
// kernel: tpu_custom_call.1
= control target key start
LH: loop header
LB: loop body
LE: loop exit
PB: predicated region body
PF: predicated region fallthrough
CT: control target
= control target key end

     0   :  { %7 = vsyncpa [#allocation3], 0  ;;  %s225_s0 = inlined_call_operand.hbm [shape: f32[8,32], index: 0, kind: input, shape index: {}]   ;;  %s226_s1 = inlined_call_operand.hbm [shape: f32[8,32], index: 1, kind: input, shape index: {}]   ;;  %s227_s2 = inlined_call_operand.hbm [shape: f32[1,128], index: 2, kind: output, shape index: {}]  }
   0x1   :  { %8 = vsyncpa [#allocation6], 0 }
   0x2   :  { %9 = vsyncpa [#allocation4], 0  ;;  %s169_s9 = smov [#allocation2]   ;;  %s170_s11 = smov [#allocation5]  }
   0x3   :  { %s16_s10 = sshll.u32 %s169_s9, 4  ;;  %s26_s12 = sshll.u32 %s170_s11, 4  ;;  %s17_s10 = int_to_ptr.vmem [resolvable:$true] %s16_s10  ;;  %s27_s12 = int_to_ptr.vmem [resolvable:$true] %s26_s12 }
   0x4   :  { %s97_s15 = scalar_lea.hbm %s225_s0, 128 }
   0x5   :  { %p98_p0 = scmp.ne.s32.totalorder %s225_s0, %s97_s15  ;;  %p101_p1 = scmp.lt.u32.totalorder %s97_s15, %s225_s0 }
   0x7   :  { %p103_p2 = pnand %p101_p1, %p98_p0 }
   0x9   :  { %106 = shalt.err (!%p103_p2)
}
   0xa   :  { %s107_s20 = scalar_lea.vmem %s17_s10, 128  ;;  %p112_p4 = scmp.lt.s32.totalorder %s17_s10, %s17_s10 }
   0xb   :  { %p108_p3 = scmp.ne.s32.totalorder %s17_s10, %s107_s20  ;;  %p113_p5 = scmp.lt.s32.totalorder %s107_s20, %s107_s20 }
   0xd   :  { %p114_p6 = por %p113_p5, %p112_p4 }
   0xf   :  { %p115_p7 = pnand %p114_p6, %p108_p3 }
  0x11   :  { %118 = shalt.err (!%p115_p7)
}
  0x12   :  { %19 = dma.hbm_to_vmem [thread:$0]  %s225_s0, 128, %s17_s10, [#allocation3]  }
  0x13   :  { %s119_s25 = scalar_lea.hbm %s226_s1, 128 }
  0x14   :  { %p120_p8 = scmp.ne.s32.totalorder %s226_s1, %s119_s25  ;;  %p123_p9 = scmp.lt.u32.totalorder %s119_s25, %s226_s1 }
  0x16   :  { %p125_p10 = pnand %p123_p9, %p120_p8 }
  0x18   :  { %128 = shalt.err (!%p125_p10)
}
  0x19   :  { %s129_s30 = scalar_lea.vmem %s27_s12, 128  ;;  %p134_p12 = scmp.lt.s32.totalorder %s27_s12, %s27_s12 }
  0x1a   :  { %p130_p11 = scmp.ne.s32.totalorder %s27_s12, %s129_s30  ;;  %p135_p13 = scmp.lt.s32.totalorder %s129_s30, %s129_s30 }
  0x1c   :  { %p136_p0 = por %p135_p13, %p134_p12 }
  0x1e   :  { %p137_p1 = pnand %p136_p0, %p130_p11 }
  0x20   :  { %140 = shalt.err (!%p137_p1)
}
  0x21   :  { %29 = dma.hbm_to_vmem [thread:$0]  %s226_s1, 128, %s27_s12, [#allocation6]  }
  0x22   :  { %163 = dma.done.wait [#allocation3], 128  }
  0x23   :  { %164 = vsyncadd [#allocation3], 4294967168 }
  0x24   :  { %165 = dma.done.wait [#allocation6], 128  }
  0x25   :  { %166 = vsyncadd [#allocation6], 4294967168  ;;  %v36_v0 = vld [vmem:[#allocation2] sm:$0xff]  ;;  %v37_v1 = vld [vmem:[#allocation5] sm:$0xff]  ;;  %vm41_vm0 = vcmask 261120   ;;  %v171_v3 = vmov 0  }
  0x26   :  { %v91_v2 = vround.rtne.f32 %v36_v0  ;;  %v172_v17 = vmov 0.0   ;;  %s173_s1 = smov [#allocation7]  }
  0x27   :  { %s80_s4 = sshll.u32 %s173_s1, 4  ;;  %s81_s4 = int_to_ptr.vmem [resolvable:$true] %s80_s4 }
  0x28   :  { %vm39_vm1 = vcmp.ne.f32.partialorder %v91_v2, %v37_v1  ;;  %s141_s5 = scalar_lea.vmem %s81_s4, 16  ;;  %s145_s6 = scalar_lea.vmem %s81_s4, 32 }
  0x29   :  { %v40_v4 = vsel %vm39_vm1, 1, %v171_v3  ;;  %p142_p2 = scmp.ne.s32.totalorder %s81_s4, %s141_s5  ;;  %p146_p3 = scmp.lt.s32.totalorder %s81_s4, %s81_s4 }
  0x2a   :  { %v42_v5 = vsel %vm41_vm0, %v40_v4, 2147483648  ;;  %p147_p4 = scmp.lt.s32.totalorder %s145_s6, %s141_s5 }
  0x2b   :  { %v44_v6 = vshra.s32 %v42_v5, 16  ;;  %v43_v8 = vand.u32 65535, %v42_v5 }
  0x2c   :  { %p148_p5 = por %p147_p4, %p146_p3 }
  0x2d   :  { %v46_v7 = vcvt.s32.f32 %v44_v6  ;;  %v45_v9 = vcvt.s32.f32 %v43_v8 }
  0x2e   :  { %p149_p6 = pnand %p148_p5, %p142_p2 }
  0x2f   :  { %47 = vmax.xlane.f32.xlu0 %v46_v7 }
  0xbc   :  { %v48_v10 = vpop.xlane.xlu0 %47 }
  0xbd   :  { %vm49_vm2 = vcmp.eq.f32.partialorder %v46_v7, %v48_v10  ;;  %v54_v12 = vcvt.f32.s32 %v48_v10 }
  0xbe   :  { %v50_v11 = vsel %vm49_vm2, %v45_v9, -inf }
  0xbf   :  { %51 = vmax.xlane.f32.xlu0 %v50_v11  ;;  %v55_v14 = vshll.u32 %v54_v12, 16 }
 0x14c   :  { %v52_v13 = vpop.xlane.xlu0 %51 }
 0x14d   :  { %v53_v15 = vcvt.f32.s32 %v52_v13 }
 0x14f   :  { %v56_v16 = vadd.s32 %v55_v14, %v53_v15 }
 0x151   :  { %vm63_vm3 = vcmp.eq.s32.totalorder %v56_v16, 0 }
 0x152   :  { %v90_v18 = vsel %vm63_vm3, 1.0, %v172_v17 }
 0x153   :  { %v67_v19 = vrot.slane %v90_v18, 4 }
 0x155   :  { %v68_v20 = vadd.f32 %v90_v18, %v67_v19 }
 0x157   :  { %v69_v21 = vrot.slane %v68_v20, 2 }
 0x159   :  { %v70_v22 = vadd.f32 %v69_v21, %v68_v20 }
 0x15b   :  { %v71_v23 = vrot.slane %v70_v22, 1 }
 0x15d   :  { %v72_v24 = vadd.f32 %v71_v23, %v70_v22 }
 0x15f   :  { %73 = vst [vmem:[#allocation7] sm:$0x1] %v72_v24 }
 0x160   :  { %152 = shalt.err (!%p149_p6)
}
 0x161   :  { %s153_s9 = scalar_lea.hbm %s227_s2, 16 }
 0x162   :  { %p154_p7 = scmp.ne.s32.totalorder %s227_s2, %s153_s9  ;;  %p157_p8 = scmp.lt.u32.totalorder %s153_s9, %s227_s2 }
 0x164   :  { %p159_p9 = pnand %p157_p8, %p154_p7 }
 0x166   :  { %162 = shalt.err (!%p159_p9)
}
 0x167   :  { %83 = dma.vmem_to_hbm [thread:$0]  %s81_s4, 16, %s227_s2, [#allocation4]  }
 0x168   :  { %167 = dma.done.wait [#allocation4], 16  }
 0x169   :  { %168 = vsyncadd [#allocation4], 4294967280 }
 0x16a   :  { %87 = vsyncpa [#allocation3], 1 }
 0x16b   :  { %88 = vsyncpa [#allocation6], 1 }
 0x16c   :  { %89 = vsyncpa [#allocation4], 1 }

</bundles_post_ra>
